<compile_context>
chip_gen: v5e
topology: v5e:2x2
jax: 0.10.0
libtpu: 0.0.40
codegen_flags: <defaults>
</compile_context>

<pallas_src>
import functools

import jax
import jax.numpy as jnp
from jax.experimental import pallas as pl
from jax.experimental.pallas import tpu as pltpu

NUM_BINS = 16
LANES = 128
EPS = 1e-6


def _dfl_kernel(logits_ref, target_ref, bdiag_ref, expand_ref, out_ref, *,
                num_bins, tile_rows, m_total, needs_mask):
    i = pl.program_id(0)
    seg = LANES // num_bins              # original rows packed per 128-lane row (8)
    shift = num_bins.bit_length() - 1    # log2(num_bins); power-of-two enforced

    x = logits_ref[...]                  # [tr, 128] f32  (8 rows x 16 bins)
    t8 = target_ref[...]                 # [tr, 8]   f32  compact targets
    rows = x.shape[0]

    lane = jax.lax.broadcasted_iota(jnp.int32, (rows, LANES), 1)
    bin_f = (lane & (num_bins - 1)).astype(jnp.float32)   # bin index in segment

    # Target expansion on the otherwise-idle MXU: texp[p, l] = t8[p, l // 16].
    # `expand` is an exact 0/1 matrix; precision=HIGHEST keeps f32 exactness.
    texp = jnp.dot(t8, expand_ref[...],
                   precision=jax.lax.Precision.HIGHEST,
                   preferred_element_type=jnp.float32)

    # Interpolation weights (computed before clamping, as in the PyTorch ref).
    tl = jnp.floor(texp)
    wr = texp - tl
    wl = 1.0 - wr
    left_f = jnp.clip(tl, 0.0, num_bins - 1.0)
    right_f = jnp.clip(tl + 1.0, 0.0, num_bins - 1.0)
    w = (jnp.where(bin_f == left_f, wl, 0.0)
         + jnp.where(bin_f == right_f, wr, 0.0))

    # Segmented softmax pieces. Subtracting the packed-row max (>= every
    # segment max) cancels exactly in e / segment_sum.
    rowmax = jnp.max(x, axis=-1, keepdims=True)
    e = jnp.exp(x - rowmax)
    # Segment sums, already broadcast to all 16 lanes of each segment, via a
    # single MXU matmul with a block-diagonal 0/1 matrix (replaces both XLU
    # roll trees of the previous version).
    ssum = jnp.dot(e, bdiag_ref[...],
                   precision=jax.lax.Precision.HIGHEST,
                   preferred_element_type=jnp.float32)
    # Guard against a whole segment underflowing when its logits sit far below
    # the packed-row max (would otherwise give log(0) -> NaN loss).
    ssum = jnp.maximum(ssum, 1e-30)

    # -w*log(p + eps) with p = e/ssum, rewritten as w*(log(ssum)-log(e+eps*ssum)):
    # no reciprocal/divide, and the reference's 1e-6 epsilon is kept exactly.
    contrib = w * (jnp.log(ssum) - jnp.log(e + EPS * ssum))

    def tile_partial(c):
        # [tr, 128] -> (1, 8, 128): pure VPU vreg adds, no per-step XLU reduce.
        return jnp.sum(c.reshape(rows // 8, 8, LANES), axis=0).reshape(1, 8, LANES)

    if needs_mask:   # static: only emitted when a ragged / OOB tail exists
        last = pl.num_programs(0) - 1

        @pl.when(i != last)
        def _steady():
            out_ref[...] = tile_partial(contrib)

        @pl.when(i == last)
        def _tail():
            # Mask both the zero-padded rows (m..m_pad8) and the garbage rows
            # of the partial last block (>= r).  Only runs on the final step.
            rowi = jax.lax.broadcasted_iota(jnp.int32, (rows, LANES), 0)
            orig_row = (i * tile_rows + rowi) * seg + (lane >> shift)
            out_ref[...] = tile_partial(
                jnp.where(orig_row < m_total, contrib, 0.0))
    else:
        out_ref[...] = tile_partial(contrib)


def distribution_focal_loss(pred_logits, target, num_bins=NUM_BINS,
                            tile_rows=1024):
    """pred_logits: [N, 4, num_bins], target: [N, 4] -> scalar f32 loss."""
    assert pred_logits.shape[1] == 4 and pred_logits.shape[-1] == num_bins
    assert LANES % num_bins == 0, "bin axis must pack evenly into 128 lanes"
    assert num_bins & (num_bins - 1) == 0, "num_bins must be a power of two"
    seg = LANES // num_bins

    n = pred_logits.shape[0]
    m = n * 4                                    # number of (box, side) pairs

    logits2d = pred_logits.reshape(m, num_bins).astype(jnp.float32)
    target1d = target.reshape(m).astype(jnp.float32)

    # Pad only to the next multiple of `seg` rows (needed for the lane-dense
    # reshape).  When m % 8 == 0 (any even N) this is a no-op and the whole
    # wrapper is a copy-free bitcast reshape.
    m_pad = -(-m // seg) * seg
    if m_pad > m:
        logits2d = jnp.pad(logits2d, ((0, m_pad - m), (0, 0)))
        target1d = jnp.pad(target1d, (0, m_pad - m))
    r = m_pad // seg

    # Lane-dense packing: 8 consecutive (row, 16-bin) segments per 128 lanes.
    logits_packed = logits2d.reshape(r, LANES)
    target_packed = target1d.reshape(r, seg)

    # Tile size: sweepable (512/1024/2048); 1024 keeps the ~10 live (tr,128)
    # f32 intermediates + double-buffered blocks inside scoped VMEM everywhere.
    tr = max(8, min(tile_rows, -(-r // 8) * 8))
    tr = (tr // 8) * 8
    num_tiles = -(-r // tr)
    needs_mask = num_tiles * tr * seg > m

    # Constant exact 0/1 matrices driving the MXU offloads.
    lane = jnp.arange(LANES)
    bdiag = (lane[:, None] // num_bins == lane[None, :] // num_bins
             ).astype(jnp.float32)                       # [128, 128]
    expand = (jnp.arange(seg)[:, None] == lane[None, :] // num_bins
              ).astype(jnp.float32)                      # [8, 128]

    kernel = functools.partial(_dfl_kernel, num_bins=num_bins, tile_rows=tr,
                               m_total=m, needs_mask=needs_mask)

    elems = num_tiles * tr * LANES
    partials = pl.pallas_call(
        kernel,
        out_shape=jax.ShapeDtypeStruct((num_tiles, 8, LANES), jnp.float32),
        grid_spec=pltpu.PrefetchScalarGridSpec(
            num_scalar_prefetch=0,
            grid=(num_tiles,),
            in_specs=[
                pl.BlockSpec((tr, LANES), lambda i: (i, 0)),
                pl.BlockSpec((tr, seg), lambda i: (i, 0)),
                pl.BlockSpec((LANES, LANES), lambda i: (0, 0)),
                pl.BlockSpec((seg, LANES), lambda i: (0, 0)),
            ],
            out_specs=pl.BlockSpec((1, 8, LANES), lambda i: (i, 0, 0)),
        ),
        compiler_params=pltpu.CompilerParams(
            dimension_semantics=("parallel",),      # no carried state -> v7x 2-TC split
            vmem_limit_bytes=32 * 1024 * 1024),
        cost_estimate=pl.CostEstimate(
            flops=elems * (2 * LANES + 2 * seg + 24),
            transcendentals=3 * elems,
            bytes_accessed=elems * 4 + r * seg * 4
                           + num_tiles * 8 * LANES * 4 + (LANES + seg) * LANES * 4),
    )(logits_packed, target_packed, bdiag, expand)

    # Tiny final reduction of the per-tile partials (XLA, negligible).
    return jnp.sum(partials) / m


def dfl_reference(pred_logits, target, num_bins=NUM_BINS):
    """Pure-JAX reference mirroring the PyTorch forward."""
    probs = jax.nn.softmax(pred_logits.astype(jnp.float32), axis=-1)
    t = target.astype(jnp.float32)
    tl = jnp.floor(t)
    wr = t - tl
    wl = 1.0 - wr
    li = jnp.clip(tl, 0, num_bins - 1).astype(jnp.int32)
    ri = jnp.clip(tl + 1, 0, num_bins - 1).astype(jnp.int32)
    lp = jnp.take_along_axis(probs, li[..., None], axis=-1)[..., 0]
    rp = jnp.take_along_axis(probs, ri[..., None], axis=-1)[..., 0]
    loss = -jnp.log(lp + EPS) * wl - jnp.log(rp + EPS) * wr
    return jnp.mean(loss)   # == (1/4) * sum_i mean_n loss_{n,i}


if __name__ == "__main__":
    key = jax.random.PRNGKey(0)
    k1, k2, k3, k4, k5, k6 = jax.random.split(key, 6)

    # Small case (single grid step, partial block + tail mask).
    N = 8
    pred = jax.random.normal(k1, (N, 4, NUM_BINS), dtype=jnp.float32)
    tgt = jax.random.uniform(k2, (N, 4), dtype=jnp.float32,
                             minval=0.0, maxval=float(NUM_BINS - 1))
    loss = jax.block_until_ready(distribution_focal_loss(pred, tgt))
    ref = dfl_reference(pred, tgt)
    assert jnp.allclose(loss, ref, rtol=1e-5, atol=1e-5), (loss, ref)

    # Even-sized multi-tile case: copy-free wrapper path, no tail mask.
    N1 = 64
    pred1 = jax.random.normal(k3, (N1, 4, NUM_BINS), dtype=jnp.float32)
    tgt1 = jax.random.uniform(k4, (N1, 4), dtype=jnp.float32,
                              minval=0.0, maxval=float(NUM_BINS - 1))
    loss1 = jax.block_until_ready(
        distribution_focal_loss(pred1, tgt1, tile_rows=16))
    ref1 = dfl_reference(pred1, tgt1)
    assert jnp.allclose(loss1, ref1, rtol=1e-5, atol=1e-5), (loss1, ref1)

    # Odd-sized case exercising padding, multiple tiles + ragged-tail masking.
    N2 = 101
    pred2 = jax.random.normal(k5, (N2, 4, NUM_BINS), dtype=jnp.float32)
    tgt2 = jax.random.uniform(k6, (N2, 4), dtype=jnp.float32,
                              minval=0.0, maxval=float(NUM_BINS - 1))
    loss2 = jax.block_until_ready(
        distribution_focal_loss(pred2, tgt2, tile_rows=16))
    ref2 = dfl_reference(pred2, tgt2)
    assert jnp.allclose(loss2, ref2, rtol=1e-5, atol=1e-5), (loss2, ref2)

    print("KERNEL_OK")
</pallas_src>

<mosaic_0001>
module attributes {stable_mosaic.version = 11 : i64} {
  func.func @_dfl_kernel(%arg0: i32, %arg1: memref<8x128xf32, #tpu.memory_space<vmem>>, %arg2: memref<8x8xf32, #tpu.memory_space<vmem>>, %arg3: memref<128x128xf32, #tpu.memory_space<vmem>>, %arg4: memref<8x128xf32, #tpu.memory_space<vmem>>, %arg5: memref<1x8x128xf32, #tpu.memory_space<vmem>>) attributes {dimension_semantics = [#tpu.dimension_semantics<parallel>], iteration_bounds = array<i64: 1>, scalar_prefetch = 0 : i64, scratch_operands = 0 : i64, tpu.core_type = #tpu.core_type<tc>, window_params = [{transform_indices = @transform_0, window_bounds = array<i64: 8, 128>}, {transform_indices = @transform_1, window_bounds = array<i64: 8, 8>}, {pipeline_mode = #tpu.pipeline_mode<synchronous>, transform_indices = @transform_2, window_bounds = array<i64: 128, 128>}, {pipeline_mode = #tpu.pipeline_mode<synchronous>, transform_indices = @transform_3, window_bounds = array<i64: 8, 128>}, {transform_indices = @transform_4, window_bounds = array<i64: 1, 8, 128>}]} {
    %c0 = arith.constant 0 : index
    %c0_0 = arith.constant 0 : index
    %0 = vector.load %arg1[%c0, %c0_0] : memref<8x128xf32, #tpu.memory_space<vmem>>, vector<8x128xf32>
    %c0_1 = arith.constant 0 : index
    %c0_2 = arith.constant 0 : index
    %1 = vector.load %arg2[%c0_1, %c0_2] : memref<8x8xf32, #tpu.memory_space<vmem>>, vector<8x8xf32>
    %2 = tpu.iota {dimensions = array<i32: 1>} : vector<8x128xi32>
    %c15_i32 = arith.constant 15 : i32
    %3 = vector.broadcast %c15_i32 : i32 to vector<8x128xi32>
    %4 = arith.andi %2, %3 : vector<8x128xi32>
    %5 = arith.sitofp %4 : vector<8x128xi32> to vector<8x128xf32>
    %c0_3 = arith.constant 0 : index
    %c0_4 = arith.constant 0 : index
    %6 = vector.load %arg4[%c0_3, %c0_4] : memref<8x128xf32, #tpu.memory_space<vmem>>, vector<8x128xf32>
    %cst = arith.constant dense<0.000000e+00> : vector<8x128xf32>
    %7 = tpu.matmul %1, %6, %cst {dimension_numbers = #tpu.dot_dimension_numbers<[1], [0], [0], [1], [0, 0, 1, 1], [], []>, precision = #tpu.contract_precision<fp32>} : vector<8x8xf32>, vector<8x128xf32>, vector<8x128xf32> -> vector<8x128xf32>
    %8 = math.floor %7 : vector<8x128xf32>
    %9 = arith.subf %7, %8 : vector<8x128xf32>
    %cst_5 = arith.constant 1.000000e+00 : f32
    %10 = vector.broadcast %cst_5 : f32 to vector<8x128xf32>
    %11 = arith.subf %10, %9 : vector<8x128xf32>
    %cst_6 = arith.constant 0.000000e+00 : f32
    %cst_7 = arith.constant 1.500000e+01 : f32
    %12 = vector.broadcast %cst_6 : f32 to vector<8x128xf32>
    %13 = arith.maximumf %12, %8 : vector<8x128xf32>
    %14 = vector.broadcast %cst_7 : f32 to vector<8x128xf32>
    %15 = arith.minimumf %14, %13 : vector<8x128xf32>
    %cst_8 = arith.constant 1.000000e+00 : f32
    %16 = vector.broadcast %cst_8 : f32 to vector<8x128xf32>
    %17 = arith.addf %8, %16 : vector<8x128xf32>
    %cst_9 = arith.constant 0.000000e+00 : f32
    %cst_10 = arith.constant 1.500000e+01 : f32
    %18 = vector.broadcast %cst_9 : f32 to vector<8x128xf32>
    %19 = arith.maximumf %18, %17 : vector<8x128xf32>
    %20 = vector.broadcast %cst_10 : f32 to vector<8x128xf32>
    %21 = arith.minimumf %20, %19 : vector<8x128xf32>
    %22 = arith.cmpf oeq, %5, %15 : vector<8x128xf32>
    %cst_11 = arith.constant 0.000000e+00 : f32
    %23 = vector.broadcast %cst_11 : f32 to vector<8x128xf32>
    %24 = arith.select %22, %11, %23 : vector<8x128xi1>, vector<8x128xf32>
    %25 = arith.cmpf oeq, %5, %21 : vector<8x128xf32>
    %cst_12 = arith.constant 0.000000e+00 : f32
    %26 = vector.broadcast %cst_12 : f32 to vector<8x128xf32>
    %27 = arith.select %25, %9, %26 : vector<8x128xi1>, vector<8x128xf32>
    %28 = arith.addf %24, %27 : vector<8x128xf32>
    %cst_13 = arith.constant dense<0xFF800000> : vector<8xf32>
    %29 = vector.multi_reduction <maximumf>, %0, %cst_13 [1] : vector<8x128xf32> to vector<8xf32>
    %30 = vector.shape_cast %29 : vector<8xf32> to vector<8x1xf32>
    %31 = vector.broadcast %30 : vector<8x1xf32> to vector<8x128xf32>
    %32 = arith.subf %0, %31 : vector<8x128xf32>
    %33 = math.exp %32 : vector<8x128xf32>
    %c0_14 = arith.constant 0 : index
    %c0_15 = arith.constant 0 : index
    %34 = vector.load %arg3[%c0_14, %c0_15] : memref<128x128xf32, #tpu.memory_space<vmem>>, vector<128x128xf32>
    %cst_16 = arith.constant dense<0.000000e+00> : vector<8x128xf32>
    %35 = tpu.matmul %33, %34, %cst_16 {dimension_numbers = #tpu.dot_dimension_numbers<[1], [0], [0], [1], [0, 0, 1, 1], [], []>, precision = #tpu.contract_precision<fp32>} : vector<8x128xf32>, vector<128x128xf32>, vector<8x128xf32> -> vector<8x128xf32>
    %cst_17 = arith.constant 1.000000e-30 : f32
    %36 = vector.broadcast %cst_17 : f32 to vector<8x128xf32>
    %37 = arith.maximumf %35, %36 : vector<8x128xf32>
    %38 = math.log %37 : vector<8x128xf32>
    %cst_18 = arith.constant 9.99999997E-7 : f32
    %39 = vector.broadcast %cst_18 : f32 to vector<8x128xf32>
    %40 = arith.mulf %39, %37 : vector<8x128xf32>
    %41 = arith.addf %33, %40 : vector<8x128xf32>
    %42 = math.log %41 : vector<8x128xf32>
    %43 = arith.subf %38, %42 : vector<8x128xf32>
    %44 = arith.mulf %28, %43 : vector<8x128xf32>
    %c0_i32 = arith.constant 0 : i32
    %45 = arith.cmpi ne, %arg0, %c0_i32 : i32
    %46 = arith.extui %45 : i1 to i32
    %c0_i32_19 = arith.constant 0 : i32
    %47 = arith.cmpi ne, %46, %c0_i32_19 : i32
    scf.if %47 {
      %51 = vector.shape_cast %44 : vector<8x128xf32> to vector<1x8x128xf32>
      %cst_22 = arith.constant dense<0.000000e+00> : vector<8x128xf32>
      %52 = vector.multi_reduction <add>, %51, %cst_22 [0] : vector<1x8x128xf32> to vector<8x128xf32>
      %53 = vector.shape_cast %52 : vector<8x128xf32> to vector<1x8x128xf32>
      %c0_23 = arith.constant 0 : index
      %c0_24 = arith.constant 0 : index
      %c0_25 = arith.constant 0 : index
      %54 = vector.load %arg5[%c0_23, %c0_24, %c0_25] : memref<1x8x128xf32, #tpu.memory_space<vmem>>, vector<1x8x128xf32>
      tpu.vector_store %arg5[%c0_23, %c0_24, %c0_25], %53 {strides = array<i32>} : memref<1x8x128xf32, #tpu.memory_space<vmem>>, vector<1x8x128xf32>,
    } else {
    }
    %c0_i32_20 = arith.constant 0 : i32
    %48 = arith.cmpi eq, %arg0, %c0_i32_20 : i32
    %49 = arith.extui %48 : i1 to i32
    %c0_i32_21 = arith.constant 0 : i32
    %50 = arith.cmpi ne, %49, %c0_i32_21 : i32
    scf.if %50 {
      %51 = tpu.iota {dimensions = array<i32: 0>} : vector<8x128xi32>
      %c8_i32 = arith.constant 8 : i32
      %52 = arith.muli %arg0, %c8_i32 : i32
      %53 = vector.broadcast %52 : i32 to vector<8x128xi32>
      %54 = arith.addi %53, %51 : vector<8x128xi32>
      %c8_i32_22 = arith.constant 8 : i32
      %55 = vector.broadcast %c8_i32_22 : i32 to vector<8x128xi32>
      %56 = arith.muli %54, %55 : vector<8x128xi32>
      %c4_i32 = arith.constant 4 : i32
      %57 = vector.broadcast %c4_i32 : i32 to vector<8x128xi32>
      %58 = arith.shrsi %2, %57 : vector<8x128xi32>
      %59 = arith.addi %56, %58 : vector<8x128xi32>
      %c32_i32 = arith.constant 32 : i32
      %60 = vector.broadcast %c32_i32 : i32 to vector<8x128xi32>
      %61 = arith.cmpi slt, %59, %60 : vector<8x128xi32>
      %cst_23 = arith.constant 0.000000e+00 : f32
      %62 = vector.broadcast %cst_23 : f32 to vector<8x128xf32>
      %63 = arith.select %61, %44, %62 : vector<8x128xi1>, vector<8x128xf32>
      %64 = vector.shape_cast %63 : vector<8x128xf32> to vector<1x8x128xf32>
      %cst_24 = arith.constant dense<0.000000e+00> : vector<8x128xf32>
      %65 = vector.multi_reduction <add>, %64, %cst_24 [0] : vector<1x8x128xf32> to vector<8x128xf32>
      %66 = vector.shape_cast %65 : vector<8x128xf32> to vector<1x8x128xf32>
      %c0_25 = arith.constant 0 : index
      %c0_26 = arith.constant 0 : index
      %c0_27 = arith.constant 0 : index
      %67 = vector.load %arg5[%c0_25, %c0_26, %c0_27] : memref<1x8x128xf32, #tpu.memory_space<vmem>>, vector<1x8x128xf32>
      tpu.vector_store %arg5[%c0_25, %c0_26, %c0_27], %66 {strides = array<i32>} : memref<1x8x128xf32, #tpu.memory_space<vmem>>, vector<1x8x128xf32>,
    } else {
    }
    return
  }
  func.func @transform_0(%arg0: i32) -> (i32, i32) {
    %c0_i32 = arith.constant 0 : i32
    %c0_i32_0 = arith.constant 0 : i32
    return %arg0, %c0_i32 : i32, i32
  }
  func.func @transform_1(%arg0: i32) -> (i32, i32) {
    %c0_i32 = arith.constant 0 : i32
    %c0_i32_0 = arith.constant 0 : i32
    return %arg0, %c0_i32 : i32, i32
  }
  func.func @transform_2(%arg0: i32) -> (i32, i32) {
    %c0_i32 = arith.constant 0 : i32
    %c0_i32_0 = arith.constant 0 : i32
    %c0_i32_1 = arith.constant 0 : i32
    return %c0_i32, %c0_i32_0 : i32, i32
  }
  func.func @transform_3(%arg0: i32) -> (i32, i32) {
    %c0_i32 = arith.constant 0 : i32
    %c0_i32_0 = arith.constant 0 : i32
    %c0_i32_1 = arith.constant 0 : i32
    return %c0_i32, %c0_i32_0 : i32, i32
  }
  func.func @transform_4(%arg0: i32) -> (i32, i32, i32) {
    %c0_i32 = arith.constant 0 : i32
    %c0_i32_0 = arith.constant 0 : i32
    %c0_i32_1 = arith.constant 0 : i32
    return %arg0, %c0_i32, %c0_i32_0 : i32, i32, i32
  }
}

</mosaic_0001>

<bundles_post_ra>
// kernel: tpu_custom_call.1
= control target key start
LH: loop header
LB: loop body
LE: loop exit
PB: predicated region body
PF: predicated region fallthrough
CT: control target
= control target key end

     0   :  { %9 = vsyncpa [#allocation3], 0  ;;  %s1114_s0 = inlined_call_operand.hbm [shape: f32[4,128], index: 0, kind: input, shape index: {}]   ;;  %s1115_s1 = inlined_call_operand.hbm [shape: f32[4,8], index: 1, kind: input, shape index: {}]   ;;  %s1116_s2 = inlined_call_operand.hbm [shape: f32[128,128], index: 2, kind: input, shape index: {}]   ;;  %s1117_s3 = inlined_call_operand.hbm [shape: f32[8,128], index: 3, kind: input, shape index: {}]   ;;  %s1118_s4 = inlined_call_operand.hbm [shape: f32[1,8,128], index: 4, kind: output, shape index: {}]  }
   0x1   :  { %10 = vsyncpa [#allocation6], 0 }
   0x2   :  { %11 = vsyncpa [#allocation9], 0 }
   0x3   :  { %12 = vsyncpa [#allocation4], 0 }
   0x4   :  { %16 = vsyncadd [#allocation3], 64  ;;  %s17_s17 = sshll.u32 %s1114_s0, 4  ;;  %s804_s18 = smov [#allocation2]   ;;  %s18_s17 = int_to_ptr.hbm [resolvable:$true] %s17_s17 }
   0x5   :  { %s19_s19 = sshll.u32 %s804_s18, 4  ;;  %s805_s20 = smov 64   ;;  %s20_s19 = int_to_ptr.vmem [resolvable:$true] %s19_s19 }
   0x6   :  { %s806_s21 = smov 4  }
   0x7   :  { %25 = dma.hbm_to_vmem [thread:$0]  %s18_s17, 64, %s20_s19, [#allocation3], %s805_s20, %s805_s20, %s806_s21  }
   0x8   :  { %29 = vsyncadd [#allocation6], 64  ;;  %s30_s24 = sshll.u32 %s1115_s1, 4  ;;  %s807_s25 = smov [#allocation5]   ;;  %s31_s24 = int_to_ptr.hbm [resolvable:$true] %s30_s24 }
   0x9   :  { %s32_s26 = sshll.u32 %s807_s25, 4  ;;  %s43_s0 = sshll.u32 %s1116_s2, 4  ;;  %s33_s26 = int_to_ptr.vmem [resolvable:$true] %s32_s26  ;;  %s44_s0 = int_to_ptr.hbm [resolvable:$true] %s43_s0 }
   0xa   :  { %38 = dma.hbm_to_vmem [thread:$0]  %s31_s24, 64, %s33_s26, [#allocation6], %s805_s20, %s805_s20, %s806_s21  }
   0xb   :  { %s808_s29 = smov [#allocation7]   ;;  %s809_s5 = smov 128  }
   0xc   :  { %s45_s30 = sshll.u32 %s808_s29, 4  ;;  %s810_s6 = smov 8   ;;  %s46_s30 = int_to_ptr.vmem [resolvable:$true] %s45_s30 }
   0xd   :  { %51 = dma.hbm_to_vmem [thread:$0]  %s44_s0, 2048, %s46_s30, [#allocation6], %s809_s5, %s809_s5, %s810_s6  }
   0xe   :  { %s57_s1 = sshll.u32 %s1117_s3, 4  ;;  %s811_s9 = smov [#allocation8]   ;;  %s58_s1 = int_to_ptr.hbm [resolvable:$true] %s57_s1 }
   0xf   :  { %s59_s10 = sshll.u32 %s811_s9, 4  ;;  %s60_s10 = int_to_ptr.vmem [resolvable:$true] %s59_s10 }
  0x10   :  { %62 = dma.hbm_to_vmem [thread:$0]  %s58_s1, 128, %s60_s10, [#allocation9]  }
  0x11   :  { %796 = dma.done.wait [#allocation3], 128  }
  0x12   :  { %797 = vsyncadd [#allocation3], 4294967168 }
  0x13   :  { %798 = dma.done.wait [#allocation6], 2176  }
  0x14   :  { %799 = vsyncadd [#allocation6], 4294965120 }
  0x15   :  { %800 = dma.done.wait [#allocation9], 128  }
  0x16   :  { %801 = vsyncadd [#allocation9], 4294967168  ;;  %v850_v0 = vld [vmem:[#allocation2] sm:$0xff]  ;;  %v269_v1 = vld [vmem:[#allocation7 + $0x78] sm:$0xff]  ;;  %vm86_vm0 = vcmask 64512   ;;  %s812_s2 = smov [#allocation10]  }
  0x17   :  { %v268_v2 = vld [vmem:[#allocation7 + $0x70] sm:$0xff]  ;;  %249 = vmax.xlane.f32.xlu0 %v850_v0  ;;  %v853_v3 = vand.u32 4294901760, %v269_v1  ;;  %v267_v5 = vld [vmem:[#allocation7 + $0x68] sm:$0xff]  ;;  %v266_v6 = vld [vmem:[#allocation7 + $0x60] sm:$0xff]  ;;  %s647_s3 = sshll.u32 %s812_s2, 4  ;;  %s649_s13 = sshll.u32 %s1118_s4, 4  ;;  %s648_s3 = int_to_ptr.vmem [resolvable:$true] %s647_s3  ;;  %s650_s13 = int_to_ptr.hbm [resolvable:$true] %s649_s13 }
  0x18   :  { %v855_v4 = vand.u32 4294901760, %v268_v2  ;;  %v265_v7 = vld [vmem:[#allocation7 + $0x58] sm:$0xff]  ;;  %v857_v8 = vand.u32 4294901760, %v267_v5  ;;  %v859_v9 = vand.u32 4294901760, %v266_v6  ;;  %v264_v11 = vld [vmem:[#allocation7 + $0x50] sm:$0xff]  ;;  %v263_v12 = vld [vmem:[#allocation7 + $0x48] sm:$0xff] }
  0x19   :  { %v861_v10 = vand.u32 4294901760, %v265_v7  ;;  %v262_v13 = vld [vmem:[#allocation7 + $0x40] sm:$0xff]  ;;  %v864_v14 = vsub.f32 %v269_v1, %v853_v3  ;;  %271 = vmatpush.msra.mxu2 %v853_v3  ;;  %v870_v16 = vand.u32 4294901760, %v264_v11  ;;  %v872_v17 = vand.u32 4294901760, %v263_v12  ;;  %v80_v35 = vld [vmem:[#allocation5] sm:$0xff]  ;;  %v260_v40 = vld [vmem:[#allocation7 + $0x30] sm:$0xff] }
  0x1a   :  { %v867_v15 = vsub.f32 %v268_v2, %v855_v4  ;;  %v875_v18 = vsub.f32 %v267_v5, %v857_v8  ;;  %v878_v19 = vsub.f32 %v266_v6, %v859_v9  ;;  %v883_v21 = vand.u32 4294901760, %v262_v13  ;;  %v85_v34 = vld [vmem:[#allocation8] sm:$0xff]  ;;  %v261_v39 = vld [vmem:[#allocation7 + $0x38] sm:$0xff]  ;;  %v259_v43 = vld [vmem:[#allocation7 + $0x28] sm:$0xff] }
  0x1b   :  { %v881_v20 = vsub.f32 %v265_v7, %v861_v10  ;;  %v313_v22 = vand.u32 4294901760, %v864_v14  ;;  %273 = vmatpush.msra.mxu2 %v855_v4  ;;  %v889_v24 = vsub.f32 %v264_v11, %v870_v16  ;;  %v895_v28 = vsub.f32 %v263_v12, %v872_v17  ;;  %v258_v44 = vld [vmem:[#allocation7 + $0x20] sm:$0xff]  ;;  %v257_v53 = vld [vmem:[#allocation7 + $0x18] sm:$0xff]  ;;  %v256_v62 = vld [vmem:[#allocation7 + $0x10] sm:$0xff] }
  0x1c   :  { %v319_v23 = vand.u32 4294901760, %v867_v15  ;;  %v325_v25 = vand.u32 4294901760, %v875_v18  ;;  %v331_v26 = vand.u32 4294901760, %v878_v19  ;;  %v905_v31 = vsub.f32 %v262_v13, %v883_v21 }
  0x1d   :  { %v337_v27 = vand.u32 4294901760, %v881_v20  ;;  %v314_v29 = vsub.f32 %v864_v14, %v313_v22  ;;  %275 = vmatpush.msra.mxu2 %v857_v8  ;;  %v343_v33 = vand.u32 4294901760, %v889_v24  ;;  %v349_v42 = vand.u32 4294901760, %v895_v28 }
  0x1e   :  { %v320_v30 = vsub.f32 %v867_v15, %v319_v23  ;;  %v326_v32 = vsub.f32 %v875_v18, %v325_v25  ;;  %v332_v38 = vsub.f32 %v878_v19, %v331_v26  ;;  %v355_v46 = vand.u32 4294901760, %v905_v31 }
  0x1f   :  { %v315_v36 = vand.u32 4294901760, %v314_v29  ;;  %277 = vmatpush.msra.mxu2 %v859_v9  ;;  %v338_v41 = vsub.f32 %v881_v20, %v337_v27  ;;  %v920_v47 = vand.u32 4294901760, %v85_v34  ;;  %v88_v48 = vsel %vm86_vm0, %v80_v35, 0 }
  0x20   :  { %v321_v37 = vand.u32 4294901760, %v320_v30  ;;  %v327_v45 = vand.u32 4294901760, %v326_v32  ;;  %v344_v49 = vsub.f32 %v889_v24, %v343_v33  ;;  %v926_v50 = vand.u32 4294901760, %v88_v48 }
  0x21   :  { %316 = vmatpush.msra.mxu3 %v315_v36  ;;  %279 = vmatpush.msra.mxu2 %v861_v10  ;;  %v928_v51 = vand.u32 4294901760, %v261_v39  ;;  %v930_v52 = vand.u32 4294901760, %v260_v40  ;;  %v333_v54 = vand.u32 4294901760, %v332_v38  ;;  %v132_v55 = vsub.f32 %v85_v34, %v920_v47  ;;  %v255_v36 = vld [vmem:[#allocation7 + $0x8] sm:$0xff] }
  0x22   :  { %106 = vmatpush.msra.mxu0 %v920_v47  ;;  %v934_v56 = vand.u32 4294901760, %v259_v43  ;;  %v936_v57 = vand.u32 4294901760, %v258_v44  ;;  %v350_v58 = vsub.f32 %v895_v28, %v349_v42  ;;  %v942_v59 = vsub.f32 %v88_v48, %v926_v50 }
  0x23   :  { %322 = vmatpush.msra.mxu3 %v321_v37  ;;  %v945_v60 = vsub.f32 %v261_v39, %v928_v51  ;;  %281 = vmatpush.msra.mxu2 %v870_v16  ;;  %v949_v61 = vsub.f32 %v260_v40, %v930_v52  ;;  %v339_v63 = vand.u32 4294901760, %v338_v41  ;;  %v133_v1 = vand.u32 4294901760, %v132_v55  ;;  %v254_v41 = vld [vmem:[#allocation7] sm:$0xff] }
  0x24   :  { %v952_v2 = vsub.f32 %v259_v43, %v934_v56  ;;  %159 = vmatpush.msrb.mxu0 %v132_v55  ;;  %v954_v5 = vand.u32 4294901760, %v257_v53  ;;  %v345_v6 = vand.u32 4294901760, %v344_v49  ;;  %v356_v7 = vsub.f32 %v905_v31, %v355_v46 }
  0x25   :  { %328 = vmatpush.msra.mxu3 %v327_v45  ;;  %v109_v11 = vand.u32 4294901760, %v942_v59  ;;  %v361_v12 = vand.u32 4294901760, %v945_v60  ;;  %283 = vmatpush.msra.mxu2 %v872_v17  ;;  %v134_v13 = vsub.f32 %v132_v55, %v133_v1  ;;  %v367_v29 = vand.u32 4294901760, %v949_v61 }
  0x26   :  { %v964_v30 = vsub.f32 %v258_v44, %v936_v57  ;;  %v966_v32 = vand.u32 4294901760, %v256_v62  ;;  %v351_v34 = vand.u32 4294901760, %v350_v58  ;;  %v373_v39 = vand.u32 4294901760, %v952_v2 }
  0x27   :  { %334 = vmatpush.msra.mxu3 %v333_v54  ;;  %v110_v35 = vsub.f32 %v942_v59, %v109_v11  ;;  %285 = vmatpush.msra.mxu2 %v883_v21  ;;  %v362_v37 = vsub.f32 %v945_v60, %v361_v12  ;;  %v135_v38 = vand.u32 4294901760, %v134_v13  ;;  %v975_v40 = vsub.f32 %v257_v53, %v954_v5 }
  0x28   :  { %v357_v43 = vand.u32 4294901760, %v356_v7  ;;  %v368_v45 = vsub.f32 %v949_v61, %v367_v29  ;;  %v379_v48 = vand.u32 4294901760, %v964_v30  ;;  %v983_v49 = vsub.f32 %v256_v62, %v966_v32 }
  0x29   :  { %340 = vmatpush.msra.mxu3 %v339_v63  ;;  %v111_v44 = vand.u32 4294901760, %v110_v35  ;;  %287 = vmatpush.msra.mxu2 %v928_v51  ;;  %v985_v54 = vand.u32 4294901760, %v255_v36  ;;  %v988_v53 = vand.u32 4294901760, %v254_v41  ;;  %v363_v55 = vand.u32 4294901760, %v362_v37 }
  0x2a   :  { %136 = vmatpush.msra.mxu1 %v135_v38  ;;  %v374_v58 = vsub.f32 %v952_v2, %v373_v39  ;;  %v385_v63 = vand.u32 4294901760, %v975_v40  ;;  %v369_v62 = vand.u32 4294901760, %v368_v45  ;;  %v380_v7 = vsub.f32 %v964_v30, %v379_v48 }
  0x2b   :  { %346 = vmatpush.msra.mxu3 %v345_v6  ;;  %112 = vmatmul.f32.vlgmr.msra.gmra.mxu0 %v111_v44  ;;  %v995_v6 = vsub.f32 %v255_v36, %v985_v54  ;;  %v391_v13 = vand.u32 4294901760, %v983_v49 }
  0x2c   :  { %138 = vmatmul.f32.vlgmr.msra.gmra.mxu1 %v926_v50  ;;  %208 = vmatpush.msra.mxu0 %v133_v1  ;;  %v1005_v1 = vsub.f32 %v254_v41, %v988_v53  ;;  %v386_v35 = vsub.f32 %v975_v40, %v385_v63  ;;  %v381_v37 = vand.u32 4294901760, %v380_v7 }
  0x2d   :  { %352 = vmatpush.msra.mxu3 %v351_v34  ;;  %182 = vmatpush.msrb.mxu1 %v920_v47  ;;  %v375_v34 = vand.u32 4294901760, %v374_v58  ;;  %v397_v36 = vand.u32 4294901760, %v995_v6 }
  0x2e   :  { %289 = vmatpush.msra.mxu2 %v930_v52  ;;  %v403_v38 = vand.u32 4294901760, %v1005_v1  ;;  %v387_v41 = vand.u32 4294901760, %v386_v35 }
  0x2f   :  { %358 = vmatpush.msra.mxu3 %v357_v43  ;;  %230 = vmatpush.msra.mxu1 %v920_v47  ;;  %v392_v47 = vsub.f32 %v983_v49, %v391_v13  ;;  %v398_v43 = vsub.f32 %v995_v6, %v397_v36 }
  0x30   :  { %291 = vmatpush.msra.mxu2 %v934_v56 }
  0x31   :  { %364 = vmatpush.msra.mxu3 %v363_v55  ;;  %v393_v44 = vand.u32 4294901760, %v392_v47 }
  0x32   :  { %293 = vmatpush.msra.mxu2 %v936_v57 }
  0x33   :  { %370 = vmatpush.msra.mxu3 %v369_v62  ;;  %162 = vmatmul.f32.vlgmr.msrb.gmra.mxu0 %v942_v59  ;;  %v404_v59 = vsub.f32 %v1005_v1, %v403_v38 }
  0x34   :  { %186 = vmatmul.f32.vlgmr.msrb.gmra.mxu1 %v109_v11  ;;  %414 = vmatpush.msrb.mxu0 %v864_v14  ;;  %v399_v11 = vand.u32 4294901760, %v398_v43 }
  0x35   :  { %376 = vmatpush.msra.mxu3 %v375_v34  ;;  %467 = vmatpush.msrb.mxu1 %v853_v3  ;;  %v405_v45 = vand.u32 4294901760, %v404_v59 }
  0x36   :  { %295 = vmatpush.msra.mxu2 %v954_v5  ;;  %417 = vmatpush.msrb.mxu0 %v867_v15 }
  0x37   :  { %382 = vmatpush.msra.mxu3 %v381_v37  ;;  %469 = vmatpush.msrb.mxu1 %v855_v4 }
  0x38   :  { %297 = vmatpush.msra.mxu2 %v966_v32  ;;  %420 = vmatpush.msrb.mxu0 %v875_v18 }
  0x39   :  { %388 = vmatpush.msra.mxu3 %v387_v41  ;;  %471 = vmatpush.msrb.mxu1 %v857_v8 }
  0x3a   :  { %299 = vmatpush.msra.mxu2 %v985_v54  ;;  %423 = vmatpush.msrb.mxu0 %v878_v19 }
  0x3b   :  { %394 = vmatpush.msra.mxu3 %v393_v44  ;;  %210 = vmatmul.f32.vlgmr.msra.gmra.mxu0 %v926_v50 }
  0x3c   :  { %473 = vmatpush.msrb.mxu1 %v859_v9  ;;  %426 = vmatpush.msrb.mxu0 %v881_v20 }
  0x3d   :  { %400 = vmatpush.msra.mxu3 %v399_v11  ;;  %232 = vmatmul.f32.vlgmr.msra.gmra.mxu1 %v926_v50  ;;  %v81_v50 = vlaneseq }
  0x3e   :  { %301 = vmatpush.msra.mxu2 %v988_v53  ;;  %429 = vmatpush.msrb.mxu0 %v889_v24 }
  0x3f   :  { %406 = vmatpush.msra.mxu3 %v405_v45  ;;  %475 = vmatpush.msrb.mxu1 %v861_v10 }
  0x40   :  { %432 = vmatpush.msrb.mxu0 %v895_v28  ;;  %508 = vmatpush.msrb.mxu2 %v313_v22 }
  0x41   :  { %575 = vmatpush.msrb.mxu3 %v853_v3  ;;  %477 = vmatpush.msrb.mxu1 %v870_v16 }
  0x42   :  { %435 = vmatpush.msrb.mxu0 %v905_v31  ;;  %512 = vmatpush.msrb.mxu2 %v319_v23 }
  0x43   :  { %577 = vmatpush.msrb.mxu3 %v855_v4  ;;  %479 = vmatpush.msrb.mxu1 %v872_v17 }
  0x44   :  { %438 = vmatpush.msrb.mxu0 %v945_v60  ;;  %516 = vmatpush.msrb.mxu2 %v325_v25 }
  0x45   :  { %579 = vmatpush.msrb.mxu3 %v857_v8  ;;  %481 = vmatpush.msrb.mxu1 %v883_v21 }
  0x46   :  { %441 = vmatpush.msrb.mxu0 %v949_v61  ;;  %520 = vmatpush.msrb.mxu2 %v331_v26  ;;  %v82_v61 = vand.u32 127, %v81_v50 }
  0x47   :  { %581 = vmatpush.msrb.mxu3 %v859_v9  ;;  %483 = vmatpush.msrb.mxu1 %v928_v51 }
  0x48   :  { %444 = vmatpush.msrb.mxu0 %v952_v2  ;;  %524 = vmatpush.msrb.mxu2 %v337_v27  ;;  %v636_v62 = vshra.s32 %v82_v61, 4 }
  0x49   :  { %583 = vmatpush.msrb.mxu3 %v861_v10  ;;  %485 = vmatpush.msrb.mxu1 %v930_v52 }
  0x4a   :  { %447 = vmatpush.msrb.mxu0 %v964_v30  ;;  %528 = vmatpush.msrb.mxu2 %v343_v33  ;;  %v83_v30 = vand.u32 15, %v82_v61 }
  0x4b   :  { %585 = vmatpush.msrb.mxu3 %v870_v16  ;;  %487 = vmatpush.msrb.mxu1 %v934_v56 }
  0x4c   :  { %450 = vmatpush.msrb.mxu0 %v975_v40  ;;  %532 = vmatpush.msrb.mxu2 %v349_v42 }
  0x4d   :  { %587 = vmatpush.msrb.mxu3 %v872_v17  ;;  %489 = vmatpush.msrb.mxu1 %v936_v57 }
  0x4e   :  { %453 = vmatpush.msrb.mxu0 %v983_v49  ;;  %536 = vmatpush.msrb.mxu2 %v355_v46 }
  0x4f   :  { %589 = vmatpush.msrb.mxu3 %v883_v21  ;;  %491 = vmatpush.msrb.mxu1 %v954_v5 }
  0x50   :  { %456 = vmatpush.msrb.mxu0 %v995_v6  ;;  %540 = vmatpush.msrb.mxu2 %v361_v12 }
  0x51   :  { %591 = vmatpush.msrb.mxu3 %v928_v51  ;;  %493 = vmatpush.msrb.mxu1 %v966_v32 }
  0x52   :  { %459 = vmatpush.msrb.mxu0 %v1005_v1  ;;  %544 = vmatpush.msrb.mxu2 %v367_v29 }
  0x53   :  { %593 = vmatpush.msrb.mxu3 %v930_v52  ;;  %495 = vmatpush.msrb.mxu1 %v985_v54 }
  0x54   :  { %548 = vmatpush.msrb.mxu2 %v373_v39 }
  0x55   :  { %595 = vmatpush.msrb.mxu3 %v934_v56  ;;  %497 = vmatpush.msrb.mxu1 %v988_v53 }
  0x56   :  { %552 = vmatpush.msrb.mxu2 %v379_v48 }
  0x57   :  { %597 = vmatpush.msrb.mxu3 %v936_v57 }
  0x58   :  { %556 = vmatpush.msrb.mxu2 %v385_v63 }
  0x59   :  { %599 = vmatpush.msrb.mxu3 %v954_v5 }
  0x5a   :  { %560 = vmatpush.msrb.mxu2 %v391_v13 }
  0x5b   :  { %601 = vmatpush.msrb.mxu3 %v966_v32 }
  0x5c   :  { %564 = vmatpush.msrb.mxu2 %v397_v36 }
  0x5d   :  { %603 = vmatpush.msrb.mxu3 %v985_v54  ;;  %v631_v54 = vshrl.u32 %v81_v50, 7 }
  0x5e   :  { %568 = vmatpush.msrb.mxu2 %v403_v38 }
  0x5f   :  { %605 = vmatpush.msrb.mxu3 %v988_v53  ;;  %v84_v53 = vcvt.s32.f32 %v83_v30  ;;  %v635_v6 = vmul.u32 8, %v631_v54 }
  0x61   :  { %v637_v35 = vadd.s32 %v636_v62, %v635_v6 }
  0x63   :  { %vm638_vm3 = vcmp.lt.s32.totalorder %v637_v35, 32 }
  0x8a   :  { %v250_v3 = vpop.xlane.xlu0 %249 }
  0x8b   :  { %v251_v4 = vsub.f32 %v850_v0, %v250_v3 }
  0x8d   :  { %v252_v8 = vmul.f32 1.442695, %v251_v4 }
  0x8f   :  { %670 = vpow2.f32 %v252_v8 }
  0x95   :  { %v671_v9 = vpop.eup %670 }
  0x96   :  { %v302_v10 = vand.u32 4294901760, %v671_v9 }
  0x98   :  { %408 = vmatmul.f32.vlgmr.msra.gmra.mxu3 %v302_v10  ;;  %v303_v14 = vsub.f32 %v671_v9, %v302_v10 }
  0x9a   :  { %462 = vmatmul.f32.vlgmr.msrb.gmra.mxu0 %v303_v14  ;;  %v304_v15 = vand.u32 4294901760, %v303_v14 }
  0x9c   :  { %501 = vmatmul.f32.vlgmr.msrb.gmra.mxu1 %v304_v15  ;;  %v305_v16 = vsub.f32 %v303_v14, %v304_v15 }
  0x9e   :  { %v306_v17 = vand.u32 4294901760, %v305_v16 }
  0xa0   :  { %307 = vmatmul.f32.vlgmr.msra.gmra.mxu2 %v306_v17  ;;  %607 = vmatmul.f32.vlgmr.msrb.gmra.mxu3 %v302_v10 }
  0xa8   :  { %570 = vmatmul.f32.vlgmr.msrb.gmra.mxu2 %v302_v10  ;;  %v113_v18 = vpop.f32.mrf.mxu0 }
  0xa9   :  { %v139_v19 = vpop.f32.mrf.mxu1 }
  0xaa   :  { %v140_v21 = vadd.f32 %v139_v19, %v113_v18 }
  0xb0   :  { %v163_v20 = vpop.f32.mrf.mxu0 }
  0xb1   :  { %v187_v22 = vpop.f32.mrf.mxu1  ;;  %v164_v0 = vadd.f32 %v163_v20, %v140_v21 }
  0xb3   :  { %v188_v23 = vadd.f32 %v187_v22, %v164_v0 }
  0xb8   :  { %v211_v24 = vpop.f32.mrf.mxu0 }
  0xb9   :  { %v212_v25 = vadd.f32 %v211_v24, %v188_v23 }
  0xba   :  { %v233_v26 = vpop.f32.mrf.mxu1 }
  0xbb   :  { %v234_v33 = vadd.f32 %v233_v26, %v212_v25 }
  0xbd   :  { %v236_v51 = vfloor.f32 %v234_v33 }
  0xbf   :  { %v241_v2 = vadd.f32 1.0, %v236_v51  ;;  %v239_v32 = vmax.f32 %v236_v51, 0.0  ;;  %v237_v48 = vsub.f32 %v234_v33, %v236_v51 }
  0xc1   :  { %v242_v39 = vmax.f32 %v241_v2, 0.0  ;;  %v240_v55 = vmin.f32 %v239_v32, 15.0  ;;  %v238_v63 = vsub.f32 1.0, %v237_v48 }
  0xc3   :  { %v243_v58 = vmin.f32 %v242_v39, 15.0  ;;  %vm244_vm1 = vcmp.eq.f32.partialorder %v84_v53, %v240_v55 }
  0xc4   :  { %v245_v1 = vsel %vm244_vm1, %v238_v63, 0.0 }
  0xc5   :  { %vm246_vm2 = vcmp.eq.f32.partialorder %v84_v53, %v243_v58 }
  0xc6   :  { %v247_v34 = vsel %vm246_vm2, %v237_v48, 0.0 }
  0xc7   :  { %v248_v47 = vadd.f32 %v247_v34, %v245_v1 }
 0x117   :  { %v463_v42 = vpop.f32.mrf.mxu0 }
 0x119   :  { %v502_v52 = vpop.f32.mrf.mxu1 }
 0x11b   :  { %v409_v27 = vpop.f32.mrf.mxu3 }
 0x123   :  { %v308_v28 = vpop.f32.mrf.mxu2  ;;  %v608_v5 = vpop.f32.mrf.mxu3 }
 0x124   :  { %v410_v31 = vadd.f32 %v409_v27, %v308_v28 }
 0x126   :  { %v464_v46 = vadd.f32 %v463_v42, %v410_v31 }
 0x128   :  { %v503_v56 = vadd.f32 %v502_v52, %v464_v46 }
 0x12b   :  { %v571_v57 = vpop.f32.mrf.mxu2 }
 0x12c   :  { %v572_v60 = vadd.f32 %v571_v57, %v503_v56 }
 0x12e   :  { %v609_v12 = vadd.f32 %v608_v5, %v572_v60 }
 0x130   :  { %v611_v29 = vmax.f32 %v609_v12, 1e-30 }
 0x132   :  { %v614_v40 = vmul.f32 1e-06, %v611_v29  ;;  %672 = vlog2.f32 %v611_v29 }
 0x134   :  { %v615_v49 = vadd.f32 %v671_v9, %v614_v40 }
 0x136   :  { %674 = vlog2.f32 %v615_v49 }
 0x138   :  { %v673_v7 = vpop.eup %672 }
 0x139   :  { %v613_v36 = vmul.f32 0.6931472, %v673_v7 }
 0x13c   :  { %v675_v13 = vpop.eup %674 }
 0x13d   :  { %v617_v37 = vmul.f32 0.6931472, %v675_v13 }
 0x13f   :  { %v618_v38 = vsub.f32 %v613_v36, %v617_v37 }
 0x141   :  { %v619_v41 = vmul.f32 %v618_v38, %v248_v47 }
 0x143   :  { %v639_v43 = vsel %vm638_vm3, %v619_v41, 0.0 }
 0x144   :  { %641 = vst [vmem:[#allocation10] sm:$0xff] %v639_v43 }
 0x145   :  { %652 = dma.vmem_to_hbm [thread:$0]  %s648_s3, 128, %s650_s13, [#allocation4]  }
 0x146   :  { %802 = dma.done.wait [#allocation4], 128  }
 0x147   :  { %803 = vsyncadd [#allocation4], 4294967168 }
 0x148   :  { %657 = vsyncpa [#allocation3], 1 }
 0x149   :  { %658 = vsyncpa [#allocation6], 1 }
 0x14a   :  { %659 = vsyncpa [#allocation9], 1 }
 0x14b   :  { %660 = vsyncpa [#allocation4], 1 }

</bundles_post_ra>
